<compile_context>
chip_gen: v7x
topology: tpu7x:2x2x1
jax: 0.10.0
libtpu: 0.0.40
codegen_flags: <defaults>
</compile_context>

<pallas_src>
import functools

import jax
import jax.numpy as jnp
from jax.experimental import pallas as pl
from jax.experimental.pallas import tpu as pltpu

_IN1, _OUT1 = 11, 6
_IN2, _OUT2 = 6, 1
_INV_SQRT2 = 0.7071067811865476


def _round_up(n, m):
    return ((n + m - 1) // m) * m


def _cdiv(a, b):
    return -(-a // b)


def _mlp_kernel(x_ref, w1_ref, b1_ref, w2_ref, b2_ref, o_ref):
    # x_ref : (11, TB)   batch on lanes
    # w1_ref: (6, 11)    (out, in)  -- PyTorch layout
    # b1_ref: (6, 1)
    # w2_ref: (6, 1)     (in, out)
    # b2_ref: (1, 1)
    # o_ref : (1, TB)
    x = x_ref[...]                      # (11, TB) f32
    w1 = w1_ref[...]                    # (6, 11)

    # ---- Layer 1: h = W1 @ x + b1, as 11 lane-dense VPU multiply-adds ----
    # (6,1)*(1,TB) broadcasts use Mosaic's replicated layouts; the MXU is
    # skipped on purpose for K=11, M=6.
    h = w1[:, 0:1] * x[0:1, :]          # (6, TB)
    for k in range(1, _IN1):
        h = h + w1[:, k:k + 1] * x[k:k + 1, :]
    h = h + b1_ref[...]                 # (6, 1) broadcast add

    # ---- GELU (exact, erf-based; constant mul by 1/sqrt(2), no division) --
    g = 0.5 * h * (1.0 + jax.lax.erf(h * _INV_SQRT2))

    # ---- Layer 2: z = w2 . g + b2 via broadcast-mul + sublane reduce ------
    z = jnp.sum(g * w2_ref[...], axis=0, keepdims=True) + b2_ref[...]  # (1,TB)

    # ---- Sigmoid, lane-dense store ----------------------------------------
    o_ref[...] = jax.nn.sigmoid(z)


@functools.partial(jax.jit, static_argnames=("tile_cap",))
def nn_forward(x, w1, b1, w2, b2, *, tile_cap=32768):
    """x: (B, 11) f32; w1: (11, 6); b1: (1, 6); w2: (6, 1); b2: (1, 1).
    Returns (B, 1) f32 matching PyTorch NN.forward."""
    B = x.shape[0]

    # Choose the number of tiles first, then a 128-aligned tile size, so
    # padding waste stays small for any batch size.
    n_tiles = _cdiv(max(B, 1), tile_cap)
    tile_b = _round_up(_cdiv(max(B, 1), n_tiles), 128)
    Bp = n_tiles * tile_b

    # Layout plumbing: pad (fuses into the transpose), then put the batch on
    # the lane axis -- a single extra HBM pass total.
    x32 = x.astype(jnp.float32)
    if Bp != B:
        x32 = jnp.pad(x32, ((0, Bp - B), (0, 0)))
    xt = jnp.transpose(x32)                                 # (11, Bp)

    w1k = jnp.transpose(w1).astype(jnp.float32)             # (6, 11)
    b1k = jnp.reshape(b1, (_OUT1, 1)).astype(jnp.float32)   # (6, 1)
    w2k = jnp.reshape(w2, (_IN2, 1)).astype(jnp.float32)    # (6, 1)
    b2k = jnp.reshape(b2, (1, 1)).astype(jnp.float32)       # (1, 1)

    out_t = pl.pallas_call(
        _mlp_kernel,
        out_shape=jax.ShapeDtypeStruct((1, Bp), jnp.float32),
        grid=(n_tiles,),
        in_specs=[
            pl.BlockSpec((_IN1, tile_b), lambda i: (0, i)),   # x tile (pipelined)
            pl.BlockSpec((_OUT1, _IN1), lambda i: (0, 0)),    # w1 (resident)
            pl.BlockSpec((_OUT1, 1), lambda i: (0, 0)),       # b1
            pl.BlockSpec((_IN2, 1), lambda i: (0, 0)),        # w2
            pl.BlockSpec((1, 1), lambda i: (0, 0)),           # b2
        ],
        out_specs=pl.BlockSpec((1, tile_b), lambda i: (0, i)),
        compiler_params=pltpu.CompilerParams(
            dimension_semantics=("parallel",),
        ),
        cost_estimate=pl.CostEstimate(
            flops=2 * Bp * (_IN1 * _OUT1 + _IN2 * _OUT2),
            transcendentals=Bp * (_OUT1 + _OUT2),          # erf per hidden + sigmoid
            bytes_accessed=(_IN1 + 1) * Bp * 4
            + (_OUT1 * _IN1 + _OUT1 + _IN2 + 1) * 4,
        ),
    )(xt, w1k, b1k, w2k, b2k)

    # (1, Bp) -> (Bp, 1) is a free layout-preserving reshape; then drop padding.
    return jnp.reshape(out_t, (Bp, 1))[:B]


def init_params(key):
    """Deterministic init mimicking nn.Linear's U(-1/sqrt(fan_in), 1/sqrt(fan_in))."""
    k1, k2, k3, k4 = jax.random.split(key, 4)
    bnd1 = 1.0 / jnp.sqrt(_IN1)
    bnd2 = 1.0 / jnp.sqrt(_IN2)
    w1 = jax.random.uniform(k1, (_IN1, _OUT1), jnp.float32, -bnd1, bnd1)
    b1 = jax.random.uniform(k2, (1, _OUT1), jnp.float32, -bnd1, bnd1)
    w2 = jax.random.uniform(k3, (_IN2, _OUT2), jnp.float32, -bnd2, bnd2)
    b2 = jax.random.uniform(k4, (1, _OUT2), jnp.float32, -bnd2, bnd2)
    return w1, b1, w2, b2


def _reference(x, w1, b1, w2, b2):
    h = x @ w1 + b1
    h = 0.5 * h * (1.0 + jax.lax.erf(h * _INV_SQRT2))
    z = h @ w2 + b2
    return jax.nn.sigmoid(z)


if __name__ == "__main__":
    key = jax.random.PRNGKey(0)
    kx, kx2, kp = jax.random.split(key, 3)
    w1, b1, w2, b2 = init_params(kp)

    # Small batch (exercises padding up to one 128-lane tile).
    batch = 8
    x = jax.random.normal(kx, (batch, _IN1), dtype=jnp.float32)
    out = jax.block_until_ready(nn_forward(x, w1, b1, w2, b2))
    ref = _reference(x, w1, b1, w2, b2)
    assert out.shape == (batch, 1)
    assert jnp.allclose(out, ref, atol=1e-5, rtol=1e-5)

    # Non-multiple-of-128 batch (exercises the tail-padding path).
    batch2 = 200
    x2 = jax.random.normal(kx2, (batch2, _IN1), dtype=jnp.float32)
    out2 = jax.block_until_ready(nn_forward(x2, w1, b1, w2, b2))
    ref2 = _reference(x2, w1, b1, w2, b2)
    assert out2.shape == (batch2, 1)
    assert jnp.allclose(out2, ref2, atol=1e-5, rtol=1e-5)

    print("KERNEL_OK")
</pallas_src>

<mosaic_0001>
module attributes {stable_mosaic.version = 11 : i64} {
  func.func @_mlp_kernel(%arg0: i32, %arg1: memref<11x128xf32, #tpu.memory_space<vmem>>, %arg2: memref<6x11xf32, #tpu.memory_space<vmem>>, %arg3: memref<6x1xf32, #tpu.memory_space<vmem>>, %arg4: memref<6x1xf32, #tpu.memory_space<vmem>>, %arg5: memref<1x1xf32, #tpu.memory_space<vmem>>, %arg6: memref<1x128xf32, #tpu.memory_space<vmem>>) attributes {dimension_semantics = [#tpu.dimension_semantics<parallel>], iteration_bounds = array<i64: 1>, scalar_prefetch = 0 : i64, scratch_operands = 0 : i64, tpu.core_type = #tpu.core_type<tc>, window_params = [{transform_indices = @transform_0, window_bounds = array<i64: 11, 128>}, {pipeline_mode = #tpu.pipeline_mode<synchronous>, transform_indices = @transform_1, window_bounds = array<i64: 6, 11>}, {pipeline_mode = #tpu.pipeline_mode<synchronous>, transform_indices = @transform_2, window_bounds = array<i64: 6, 1>}, {pipeline_mode = #tpu.pipeline_mode<synchronous>, transform_indices = @transform_3, window_bounds = array<i64: 6, 1>}, {pipeline_mode = #tpu.pipeline_mode<synchronous>, transform_indices = @transform_4, window_bounds = array<i64: 1, 1>}, {transform_indices = @transform_5, window_bounds = array<i64: 1, 128>}]} {
    %c0 = arith.constant 0 : index
    %c0_0 = arith.constant 0 : index
    %0 = vector.load %arg1[%c0, %c0_0] : memref<11x128xf32, #tpu.memory_space<vmem>>, vector<11x128xf32>
    %c0_1 = arith.constant 0 : index
    %c0_2 = arith.constant 0 : index
    %1 = vector.load %arg2[%c0_1, %c0_2] : memref<6x11xf32, #tpu.memory_space<vmem>>, vector<6x11xf32>
    %2 = vector.extract_strided_slice %1 {offsets = [0, 0], sizes = [6, 1], strides = [1, 1]} : vector<6x11xf32> to vector<6x1xf32>
    %3 = vector.extract_strided_slice %0 {offsets = [0, 0], sizes = [1, 128], strides = [1, 1]} : vector<11x128xf32> to vector<1x128xf32>
    %4 = vector.broadcast %2 : vector<6x1xf32> to vector<6x128xf32>
    %5 = vector.broadcast %3 : vector<1x128xf32> to vector<6x128xf32>
    %6 = arith.mulf %4, %5 : vector<6x128xf32>
    %7 = vector.extract_strided_slice %1 {offsets = [0, 1], sizes = [6, 1], strides = [1, 1]} : vector<6x11xf32> to vector<6x1xf32>
    %8 = vector.extract_strided_slice %0 {offsets = [1, 0], sizes = [1, 128], strides = [1, 1]} : vector<11x128xf32> to vector<1x128xf32>
    %9 = vector.broadcast %7 : vector<6x1xf32> to vector<6x128xf32>
    %10 = vector.broadcast %8 : vector<1x128xf32> to vector<6x128xf32>
    %11 = arith.mulf %9, %10 : vector<6x128xf32>
    %12 = arith.addf %6, %11 : vector<6x128xf32>
    %13 = vector.extract_strided_slice %1 {offsets = [0, 2], sizes = [6, 1], strides = [1, 1]} : vector<6x11xf32> to vector<6x1xf32>
    %14 = vector.extract_strided_slice %0 {offsets = [2, 0], sizes = [1, 128], strides = [1, 1]} : vector<11x128xf32> to vector<1x128xf32>
    %15 = vector.broadcast %13 : vector<6x1xf32> to vector<6x128xf32>
    %16 = vector.broadcast %14 : vector<1x128xf32> to vector<6x128xf32>
    %17 = arith.mulf %15, %16 : vector<6x128xf32>
    %18 = arith.addf %12, %17 : vector<6x128xf32>
    %19 = vector.extract_strided_slice %1 {offsets = [0, 3], sizes = [6, 1], strides = [1, 1]} : vector<6x11xf32> to vector<6x1xf32>
    %20 = vector.extract_strided_slice %0 {offsets = [3, 0], sizes = [1, 128], strides = [1, 1]} : vector<11x128xf32> to vector<1x128xf32>
    %21 = vector.broadcast %19 : vector<6x1xf32> to vector<6x128xf32>
    %22 = vector.broadcast %20 : vector<1x128xf32> to vector<6x128xf32>
    %23 = arith.mulf %21, %22 : vector<6x128xf32>
    %24 = arith.addf %18, %23 : vector<6x128xf32>
    %25 = vector.extract_strided_slice %1 {offsets = [0, 4], sizes = [6, 1], strides = [1, 1]} : vector<6x11xf32> to vector<6x1xf32>
    %26 = vector.extract_strided_slice %0 {offsets = [4, 0], sizes = [1, 128], strides = [1, 1]} : vector<11x128xf32> to vector<1x128xf32>
    %27 = vector.broadcast %25 : vector<6x1xf32> to vector<6x128xf32>
    %28 = vector.broadcast %26 : vector<1x128xf32> to vector<6x128xf32>
    %29 = arith.mulf %27, %28 : vector<6x128xf32>
    %30 = arith.addf %24, %29 : vector<6x128xf32>
    %31 = vector.extract_strided_slice %1 {offsets = [0, 5], sizes = [6, 1], strides = [1, 1]} : vector<6x11xf32> to vector<6x1xf32>
    %32 = vector.extract_strided_slice %0 {offsets = [5, 0], sizes = [1, 128], strides = [1, 1]} : vector<11x128xf32> to vector<1x128xf32>
    %33 = vector.broadcast %31 : vector<6x1xf32> to vector<6x128xf32>
    %34 = vector.broadcast %32 : vector<1x128xf32> to vector<6x128xf32>
    %35 = arith.mulf %33, %34 : vector<6x128xf32>
    %36 = arith.addf %30, %35 : vector<6x128xf32>
    %37 = vector.extract_strided_slice %1 {offsets = [0, 6], sizes = [6, 1], strides = [1, 1]} : vector<6x11xf32> to vector<6x1xf32>
    %38 = vector.extract_strided_slice %0 {offsets = [6, 0], sizes = [1, 128], strides = [1, 1]} : vector<11x128xf32> to vector<1x128xf32>
    %39 = vector.broadcast %37 : vector<6x1xf32> to vector<6x128xf32>
    %40 = vector.broadcast %38 : vector<1x128xf32> to vector<6x128xf32>
    %41 = arith.mulf %39, %40 : vector<6x128xf32>
    %42 = arith.addf %36, %41 : vector<6x128xf32>
    %43 = vector.extract_strided_slice %1 {offsets = [0, 7], sizes = [6, 1], strides = [1, 1]} : vector<6x11xf32> to vector<6x1xf32>
    %44 = vector.extract_strided_slice %0 {offsets = [7, 0], sizes = [1, 128], strides = [1, 1]} : vector<11x128xf32> to vector<1x128xf32>
    %45 = vector.broadcast %43 : vector<6x1xf32> to vector<6x128xf32>
    %46 = vector.broadcast %44 : vector<1x128xf32> to vector<6x128xf32>
    %47 = arith.mulf %45, %46 : vector<6x128xf32>
    %48 = arith.addf %42, %47 : vector<6x128xf32>
    %49 = vector.extract_strided_slice %1 {offsets = [0, 8], sizes = [6, 1], strides = [1, 1]} : vector<6x11xf32> to vector<6x1xf32>
    %50 = vector.extract_strided_slice %0 {offsets = [8, 0], sizes = [1, 128], strides = [1, 1]} : vector<11x128xf32> to vector<1x128xf32>
    %51 = vector.broadcast %49 : vector<6x1xf32> to vector<6x128xf32>
    %52 = vector.broadcast %50 : vector<1x128xf32> to vector<6x128xf32>
    %53 = arith.mulf %51, %52 : vector<6x128xf32>
    %54 = arith.addf %48, %53 : vector<6x128xf32>
    %55 = vector.extract_strided_slice %1 {offsets = [0, 9], sizes = [6, 1], strides = [1, 1]} : vector<6x11xf32> to vector<6x1xf32>
    %56 = vector.extract_strided_slice %0 {offsets = [9, 0], sizes = [1, 128], strides = [1, 1]} : vector<11x128xf32> to vector<1x128xf32>
    %57 = vector.broadcast %55 : vector<6x1xf32> to vector<6x128xf32>
    %58 = vector.broadcast %56 : vector<1x128xf32> to vector<6x128xf32>
    %59 = arith.mulf %57, %58 : vector<6x128xf32>
    %60 = arith.addf %54, %59 : vector<6x128xf32>
    %61 = vector.extract_strided_slice %1 {offsets = [0, 10], sizes = [6, 1], strides = [1, 1]} : vector<6x11xf32> to vector<6x1xf32>
    %62 = vector.extract_strided_slice %0 {offsets = [10, 0], sizes = [1, 128], strides = [1, 1]} : vector<11x128xf32> to vector<1x128xf32>
    %63 = vector.broadcast %61 : vector<6x1xf32> to vector<6x128xf32>
    %64 = vector.broadcast %62 : vector<1x128xf32> to vector<6x128xf32>
    %65 = arith.mulf %63, %64 : vector<6x128xf32>
    %66 = arith.addf %60, %65 : vector<6x128xf32>
    %c0_3 = arith.constant 0 : index
    %c0_4 = arith.constant 0 : index
    %67 = vector.load %arg3[%c0_3, %c0_4] : memref<6x1xf32, #tpu.memory_space<vmem>>, vector<6x1xf32>
    %68 = vector.broadcast %67 : vector<6x1xf32> to vector<6x128xf32>
    %69 = arith.addf %66, %68 : vector<6x128xf32>
    %cst = arith.constant 5.000000e-01 : f32
    %70 = vector.broadcast %cst : f32 to vector<6x128xf32>
    %71 = arith.mulf %70, %69 : vector<6x128xf32>
    %cst_5 = arith.constant 0.707106769 : f32
    %72 = vector.broadcast %cst_5 : f32 to vector<6x128xf32>
    %73 = arith.mulf %69, %72 : vector<6x128xf32>
    %74 = math.erf %73 : vector<6x128xf32>
    %cst_6 = arith.constant 1.000000e+00 : f32
    %75 = vector.broadcast %cst_6 : f32 to vector<6x128xf32>
    %76 = arith.addf %75, %74 : vector<6x128xf32>
    %77 = arith.mulf %71, %76 : vector<6x128xf32>
    %c0_7 = arith.constant 0 : index
    %c0_8 = arith.constant 0 : index
    %78 = vector.load %arg4[%c0_7, %c0_8] : memref<6x1xf32, #tpu.memory_space<vmem>>, vector<6x1xf32>
    %79 = vector.broadcast %78 : vector<6x1xf32> to vector<6x128xf32>
    %80 = arith.mulf %77, %79 : vector<6x128xf32>
    %cst_9 = arith.constant dense<0.000000e+00> : vector<128xf32>
    %81 = vector.multi_reduction <add>, %80, %cst_9 [0] : vector<6x128xf32> to vector<128xf32>
    %82 = vector.shape_cast %81 : vector<128xf32> to vector<1x128xf32>
    %c0_10 = arith.constant 0 : index
    %c0_11 = arith.constant 0 : index
    %83 = vector.load %arg5[%c0_10, %c0_11] : memref<1x1xf32, #tpu.memory_space<vmem>>, vector<1x1xf32>
    %84 = vector.broadcast %83 : vector<1x1xf32> to vector<1x128xf32>
    %85 = arith.addf %82, %84 : vector<1x128xf32>
    %86 = arith.negf %85 : vector<1x128xf32>
    %87 = math.exp %86 : vector<1x128xf32>
    %cst_12 = arith.constant 1.000000e+00 : f32
    %88 = vector.broadcast %cst_12 : f32 to vector<1x128xf32>
    %89 = arith.addf %88, %87 : vector<1x128xf32>
    %90 = arith.divf %88, %89 : vector<1x128xf32>
    %c0_13 = arith.constant 0 : index
    %c0_14 = arith.constant 0 : index
    %91 = vector.load %arg6[%c0_13, %c0_14] : memref<1x128xf32, #tpu.memory_space<vmem>>, vector<1x128xf32>
    tpu.vector_store %arg6[%c0_13, %c0_14], %90 {strides = array<i32>} : memref<1x128xf32, #tpu.memory_space<vmem>>, vector<1x128xf32>,
    return
  }
  func.func @transform_0(%arg0: i32) -> (i32, i32) {
    %c0_i32 = arith.constant 0 : i32
    %c0_i32_0 = arith.constant 0 : i32
    return %c0_i32, %arg0 : i32, i32
  }
  func.func @transform_1(%arg0: i32) -> (i32, i32) {
    %c0_i32 = arith.constant 0 : i32
    %c0_i32_0 = arith.constant 0 : i32
    %c0_i32_1 = arith.constant 0 : i32
    return %c0_i32, %c0_i32_0 : i32, i32
  }
  func.func @transform_2(%arg0: i32) -> (i32, i32) {
    %c0_i32 = arith.constant 0 : i32
    %c0_i32_0 = arith.constant 0 : i32
    %c0_i32_1 = arith.constant 0 : i32
    return %c0_i32, %c0_i32_0 : i32, i32
  }
  func.func @transform_3(%arg0: i32) -> (i32, i32) {
    %c0_i32 = arith.constant 0 : i32
    %c0_i32_0 = arith.constant 0 : i32
    %c0_i32_1 = arith.constant 0 : i32
    return %c0_i32, %c0_i32_0 : i32, i32
  }
  func.func @transform_4(%arg0: i32) -> (i32, i32) {
    %c0_i32 = arith.constant 0 : i32
    %c0_i32_0 = arith.constant 0 : i32
    %c0_i32_1 = arith.constant 0 : i32
    return %c0_i32, %c0_i32_0 : i32, i32
  }
  func.func @transform_5(%arg0: i32) -> (i32, i32) {
    %c0_i32 = arith.constant 0 : i32
    %c0_i32_0 = arith.constant 0 : i32
    return %c0_i32, %arg0 : i32, i32
  }
}

</mosaic_0001>

<bundles_post_ra>
// kernel: nn_forward.1
= control target key start
LH: loop header
LB: loop body
LE: loop exit
PB: predicated region body
PF: predicated region fallthrough
CT: control target
= control target key end

     0   :  { %v215_v0 = vmov 2   ;;  %v216_v1 = vmov 0   ;;  %v217_v4 = vmov 3   ;;  %v218_v5 = vmov 1   ;;  %s282_s1 = inlined_call_operand.vmem [shape: f32[6,11], index: 1, kind: input, shape index: {}]   ;;  %s283_s4 = inlined_call_operand.<no memory space> [shape: f32[1,1], index: 4, kind: input, shape index: {}]   ;;  %s284_s2 = inlined_call_operand.vmem [shape: f32[6,1], index: 2, kind: input, shape index: {}]   ;;  %s285_s3 = inlined_call_operand.vmem [shape: f32[6,1], index: 3, kind: input, shape index: {}]   ;;  %s286_s0 = inlined_call_operand.vmem [shape: f32[11,128], index: 0, kind: input, shape index: {}]   ;;  %s287_s5 = inlined_call_operand.vmem [shape: f32[1,128], index: 5, kind: output, shape index: {}]  }
   0x1   :  { %198 = vset.pattern.permute.xlu1 %v215_v0  ;;  %196 = vset.pattern.permute.xlu0 %v216_v1  ;;  %v24_v2 = vld [vmem:[%s282_s1] sm:$0x3f]  ;;  %v10_v3 = vstv %s283_s4  ;;  %v219_v6 = vmov 4   ;;  %v220_v7 = vmov 5   ;;  %v221_v8 = vmov 6  }
   0x2   :  { %46 = vperm.xlu1 %198, %v24_v2   ;;  %27 = vperm.xlu0 %196, %v24_v2   ;;  %11 = vst [vmem:[#allocation2] sm:$0x1] %v10_v3  ;;  %v222_v9 = vmov 8   ;;  %v135_v10 = vld [vmem:[%s284_s2] sm:$0x3f]  ;;  %v223_v11 = vmov 7   ;;  %v30_v16 = vlaneseq }
   0x3   :  { %v224_v12 = vmov 9   ;;  %v225_v13 = vmov 10   ;;  %v147_v14 = vld [vmem:[%s285_s3] sm:$0x3f]  ;;  %v23_v51 = vld [vmem:[%s286_s0 + $0x8] sm:$0x7] }
   0x4   :  { %v31_v17 = vshrl.u32 %v30_v16, 7  ;;  %v22_v20 = vld [vmem:[%s286_s0] sm:$0xff]  ;;  %vm154_vm0 = vcmask 1045504  }
   0x6   :  { %199 = vset.pattern.permute.xlu1 %v217_v4  ;;  %197 = vset.pattern.permute.xlu0 %v218_v5  ;;  %v268_v18 = vsub.s32 0, %v31_v17  ;;  %v41_v19 = vsub.s32 1, %v31_v17  ;;  %v51_v21 = vsub.s32 2, %v31_v17  ;;  %v61_v25 = vsub.s32 3, %v31_v17 }
   0x7   :  { %56 = vperm.xlu1 %199, %v24_v2   ;;  %36 = vperm.xlu0 %197, %v24_v2   ;;  %v71_v27 = vsub.s32 4, %v31_v17  ;;  %v81_v32 = vsub.s32 5, %v31_v17  ;;  %v91_v39 = vsub.s32 6, %v31_v17  ;;  %v101_v48 = vsub.s32 7, %v31_v17 }
   0x8   :  { %v33_v24 = vrot.slane %v22_v20, %v268_v18  ;;  %v42_v26 = vrot.slane %v22_v20, %v41_v19  ;;  %v52_v28 = vrot.slane %v22_v20, %v51_v21  ;;  %v62_v33 = vrot.slane %v22_v20, %v61_v25 }
   0x9   :  { %v162_v15 = vld [vmem:[#allocation2] sm:$0x1]  ;;  %v72_v35 = vrot.slane %v22_v20, %v71_v27  ;;  %v82_v38 = vrot.slane %v22_v20, %v81_v32  ;;  %v92_v47 = vrot.slane %v22_v20, %v91_v39  ;;  %v102_v54 = vrot.slane %v22_v20, %v101_v48 }
   0xa   :  { %v112_v55 = vrot.slane %v23_v51, %v268_v18  ;;  %v122_v62 = vrot.slane %v23_v51, %v41_v19 }
   0xb   :  { %200 = vset.pattern.permute.xlu1 %v219_v6  ;;  %201 = vset.pattern.permute.xlu0 %v220_v7 }
   0xc   :  { %66 = vperm.xlu1 %200, %v24_v2   ;;  %76 = vperm.xlu0 %201, %v24_v2  }
  0x10   :  { %202 = vset.pattern.permute.xlu1 %v221_v8  ;;  %204 = vset.pattern.permute.xlu0 %v222_v9 }
  0x11   :  { %86 = vperm.xlu1 %202, %v24_v2   ;;  %106 = vperm.xlu0 %204, %v24_v2  }
  0x15   :  { %203 = vset.pattern.permute.xlu1 %v223_v11  ;;  %207 = vset.pattern.permute.xlu0 %v216_v1 }
  0x16   :  { %96 = vperm.xlu1 %203, %v24_v2   ;;  %138 = vperm.xlu0 %207, %v135_v10  }
  0x1a   :  { %205 = vset.pattern.permute.xlu1 %v224_v12 }
  0x1b   :  { %116 = vperm.xlu1 %205, %v24_v2  }
  0x1f   :  { %206 = vset.pattern.permute.xlu1 %v225_v13 }
  0x20   :  { %126 = vperm.xlu1 %206, %v24_v2   ;;  %v132_v2 = vrot.slane %v23_v51, %v51_v21 }
  0x24   :  { %208 = vset.pattern.permute.xlu1 %v216_v1 }
  0x25   :  { %150 = vperm.xlu1 %208, %v147_v14  }
  0x29   :  { %165 = vperm.xlu1 %208, %v162_v15  }
  0x81   :  { %v47_v22 = vpop.permute.xlu1 %46  ;;  %v28_v23 = vpop.permute.xlu0 %27 }
  0x82   :  { %v34_v29 = vmul.f32 %v33_v24, %v28_v23  ;;  %v53_v36 = vmul.f32 %v52_v28, %v47_v22 }
  0x86   :  { %v57_v30 = vpop.permute.xlu1 %56  ;;  %v37_v31 = vpop.permute.xlu0 %36 }
  0x87   :  { %v43_v34 = vmul.f32 %v42_v26, %v37_v31  ;;  %v63_v40 = vmul.f32 %v62_v33, %v57_v30 }
  0x89   :  { %v44_v37 = vadd.f32 %v43_v34, %v34_v29 }
  0x8b   :  { %v54_v41 = vadd.f32 %v53_v36, %v44_v37  ;;  %v67_v42 = vpop.permute.xlu1 %66  ;;  %v77_v43 = vpop.permute.xlu0 %76 }
  0x8c   :  { %v73_v44 = vmul.f32 %v72_v35, %v67_v42  ;;  %v83_v46 = vmul.f32 %v82_v38, %v77_v43 }
  0x8d   :  { %v64_v45 = vadd.f32 %v63_v40, %v54_v41 }
  0x8f   :  { %v74_v49 = vadd.f32 %v73_v44, %v64_v45 }
  0x90   :  { %v87_v50 = vpop.permute.xlu1 %86  ;;  %v107_v57 = vpop.permute.xlu0 %106 }
  0x91   :  { %v84_v52 = vadd.f32 %v83_v46, %v74_v49  ;;  %v93_v53 = vmul.f32 %v92_v47, %v87_v50  ;;  %v113_v61 = vmul.f32 %v112_v55, %v107_v57 }
  0x93   :  { %v94_v58 = vadd.f32 %v93_v53, %v84_v52 }
  0x95   :  { %v97_v56 = vpop.permute.xlu1 %96  ;;  %v139_v6 = vpop.permute.xlu0 %138 }
  0x96   :  { %v103_v59 = vmul.f32 %v102_v54, %v97_v56 }
  0x98   :  { %v104_v60 = vadd.f32 %v103_v59, %v94_v58 }
  0x9a   :  { %v117_v63 = vpop.permute.xlu1 %116  ;;  %v114_v0 = vadd.f32 %v113_v61, %v104_v60 }
  0x9b   :  { %v123_v1 = vmul.f32 %v122_v62, %v117_v63 }
  0x9d   :  { %v124_v4 = vadd.f32 %v123_v1, %v114_v0 }
  0x9f   :  { %v127_v3 = vpop.permute.xlu1 %126 }
  0xa0   :  { %v133_v5 = vmul.f32 %v132_v2, %v127_v3 }
  0xa2   :  { %v134_v7 = vadd.f32 %v133_v5, %v124_v4 }
  0xa4   :  { %v141_v8 = vadd.f32 %v139_v6, %v134_v7  ;;  %v151_v14 = vpop.permute.xlu1 %150 }
  0xa6   :  { %v143_v9 = vmul.f32 0.70710677, %v141_v8  ;;  %v142_v11 = vmul.f32 0.5, %v141_v8 }
  0xa8   :  { %209 = verf.f32 %v143_v9  ;;  %v166_v22 = vpop.permute.xlu1 %165 }
  0xa9   :  { %v171_v25 = vrot.slane %v166_v22, %v268_v18 }
  0xb2   :  { %v210_v10 = vpop.eup %209 }
  0xb3   :  { %v145_v12 = vadd.f32 1.0, %v210_v10 }
  0xb5   :  { %v146_v13 = vmul.f32 %v145_v12, %v142_v11 }
  0xb7   :  { %v153_v15 = vmul.f32 %v151_v14, %v146_v13 }
  0xb9   :  { %v155_v16 = vsel %vm154_vm0, %v153_v15, 0.0 }
  0xba   :  { %v156_v17 = vrot.slane %v155_v16, 4 }
  0xbc   :  { %v157_v19 = vadd.f32 %v156_v17, %v155_v16 }
  0xbe   :  { %v158_v20 = vrot.slane %v157_v19, 2 }
  0xc0   :  { %v159_v21 = vadd.f32 %v158_v20, %v157_v19 }
  0xc2   :  { %v160_v23 = vrot.slane %v159_v21, 1 }
  0xc4   :  { %v161_v24 = vadd.f32 %v160_v23, %v159_v21 }
  0xc6   :  { %v172_v26 = vadd.f32 %v171_v25, %v161_v24 }
  0xc8   :  { %v184_v27 = vmul.f32 -1.442695, %v172_v26 }
  0xca   :  { %211 = vpow2.f32 %v184_v27 }
  0xd4   :  { %v212_v28 = vpop.eup %211 }
  0xd5   :  { %v176_v29 = vadd.f32 1.0, %v212_v28 }
  0xd7   :  { %213 = vrcp.f32 %v176_v29 }
  0xe1   :  { %v214_v30 = vpop.eup %213 }
  0xe2   :  { %179 = vst [vmem:[%s287_s5] sm:$0x1] %v214_v30 }

</bundles_post_ra>
